<compile_context>
chip_gen: v7x
topology: tpu7x:2x2x1
jax: 0.10.0
libtpu: 0.0.40
codegen_flags: <defaults>
</compile_context>

<pallas_src>
import jax
import jax.numpy as jnp
import numpy as np
from jax.experimental import pallas as pl
from jax.experimental.pallas import tpu as pltpu


def _round_up(x, m):
    return ((x + m - 1) // m) * m


def fcnn_kernel(x_ref, w1_ref, b1_ref, w2_ref, b2_ref, w3_ref, b3_ref, o_ref):
    """Whole 3-layer MLP on one (tb, *) batch tile; weights are VMEM-resident."""
    wdt = w1_ref.dtype                      # f32 (default) or bf16 (MXU fast path)
    x = x_ref[...].astype(wdt)              # mirrors x.float() in the torch module
    h1 = jnp.tanh(
        jnp.dot(x, w1_ref[...], preferred_element_type=jnp.float32) + b1_ref[...]
    )
    h2 = jnp.tanh(
        jnp.dot(h1.astype(wdt), w2_ref[...], preferred_element_type=jnp.float32)
        + b2_ref[...]
    )
    o_ref[...] = (
        jnp.dot(h2.astype(wdt), w3_ref[...], preferred_element_type=jnp.float32)
        + b3_ref[...]
    )


def fcnn_forward(x, params, *, batch_tile=256, weight_dtype=jnp.float32):
    """x: (B, in_dim). params: dict of w1,b1,w2,b2,w3,b3 with (fan_in, fan_out) weights."""
    B, in_dim = x.shape
    hidden = params["w1"].shape[1]
    out_dim = params["w3"].shape[1]
    f32 = jnp.float32

    LANE = 128                               # lane width (valid tile alignment on v5e/v6e/v7x)
    in_p = _round_up(in_dim, LANE)
    hid_p = _round_up(hidden, LANE)
    out_p = _round_up(out_dim, LANE)

    # Batch tile: multiple of 8 sublanes, capped by the (padded) batch size.
    tb = max(8, min(_round_up(batch_tile, 8), _round_up(B, 8)))
    Bp = _round_up(B, tb)
    grid = (Bp // tb,)

    # Zero-pad everything to lane-dense shapes.  Padded hidden columns stay exactly 0
    # through tanh (tanh(0)=0) and padded weight rows are 0, so results are unchanged;
    # padded batch rows / output columns are sliced off below.
    xp = jnp.zeros((Bp, in_p), f32).at[:B, :in_dim].set(x.astype(f32))
    w1 = jnp.zeros((in_p, hid_p), weight_dtype).at[:in_dim, :hidden].set(
        params["w1"].astype(weight_dtype))
    w2 = jnp.zeros((hid_p, hid_p), weight_dtype).at[:hidden, :hidden].set(
        params["w2"].astype(weight_dtype))
    w3 = jnp.zeros((hid_p, out_p), weight_dtype).at[:hidden, :out_dim].set(
        params["w3"].astype(weight_dtype))
    b1 = jnp.zeros((1, hid_p), f32).at[0, :hidden].set(params["b1"].astype(f32))
    b2 = jnp.zeros((1, hid_p), f32).at[0, :hidden].set(params["b2"].astype(f32))
    b3 = jnp.zeros((1, out_p), f32).at[0, :out_dim].set(params["b3"].astype(f32))

    # VMEM plan: double-buffered x/out tiles, single-buffered weights/biases,
    # plus live activations; 2x headroom, clamped to [32 MiB, 64 MiB].
    w_bytes = jnp.dtype(weight_dtype).itemsize
    need = (
        2 * tb * in_p * 4
        + 2 * tb * out_p * 4
        + (in_p * hid_p + hid_p * hid_p + hid_p * out_p) * w_bytes
        + (2 * hid_p + out_p) * 4
        + 2 * tb * hid_p * 4
    )
    vmem_limit = int(min(max(2 * need, 32 << 20), 64 << 20))

    cost = pl.CostEstimate(
        flops=2 * Bp * (in_p * hid_p + hid_p * hid_p + hid_p * out_p),
        transcendentals=2 * Bp * hid_p,
        bytes_accessed=(
            xp.size * 4
            + (w1.size + w2.size + w3.size) * w_bytes
            + (b1.size + b2.size + b3.size) * 4
            + Bp * out_p * 4
        ),
    )

    once = pl.Buffered(1)  # loop-invariant operands: no double buffering
    out = pl.pallas_call(
        fcnn_kernel,
        out_shape=jax.ShapeDtypeStruct((Bp, out_p), f32),
        grid_spec=pltpu.PrefetchScalarGridSpec(
            num_scalar_prefetch=0,
            grid=grid,
            in_specs=[
                pl.BlockSpec((tb, in_p), lambda i: (i, 0)),                          # x tile
                pl.BlockSpec((in_p, hid_p), lambda i: (0, 0), pipeline_mode=once),   # w1
                pl.BlockSpec((1, hid_p), lambda i: (0, 0), pipeline_mode=once),      # b1
                pl.BlockSpec((hid_p, hid_p), lambda i: (0, 0), pipeline_mode=once),  # w2
                pl.BlockSpec((1, hid_p), lambda i: (0, 0), pipeline_mode=once),      # b2
                pl.BlockSpec((hid_p, out_p), lambda i: (0, 0), pipeline_mode=once),  # w3
                pl.BlockSpec((1, out_p), lambda i: (0, 0), pipeline_mode=once),      # b3
            ],
            out_specs=pl.BlockSpec((tb, out_p), lambda i: (i, 0)),  # lane-dense stores
        ),
        compiler_params=pltpu.CompilerParams(
            dimension_semantics=("parallel",),   # batch axis -> megacore sharding on v7x
            vmem_limit_bytes=vmem_limit,
        ),
        cost_estimate=cost,
    )(xp, w1, b1, w2, b2, w3, b3)

    return out[:B, :out_dim]


def init_params(key, in_dim, out_dim, hidden_dim):
    """PyTorch-Linear-style init U[-1/sqrt(fan_in), 1/sqrt(fan_in)]; weights stored (fan_in, fan_out)."""
    ks = jax.random.split(key, 6)

    def lin(kw, kb, fan_in, fan_out):
        bound = 1.0 / np.sqrt(fan_in)
        w = jax.random.uniform(kw, (fan_in, fan_out), jnp.float32, -bound, bound)
        b = jax.random.uniform(kb, (fan_out,), jnp.float32, -bound, bound)
        return w, b

    w1, b1 = lin(ks[0], ks[1], in_dim, hidden_dim)
    w2, b2 = lin(ks[2], ks[3], hidden_dim, hidden_dim)
    w3, b3 = lin(ks[4], ks[5], hidden_dim, out_dim)
    return dict(w1=w1, b1=b1, w2=w2, b2=b2, w3=w3, b3=b3)


def fcnn_reference(x, p):
    h1 = jnp.tanh(x.astype(jnp.float32) @ p["w1"] + p["b1"])
    h2 = jnp.tanh(h1 @ p["w2"] + p["b2"])
    return h2 @ p["w3"] + p["b3"]


if __name__ == "__main__":
    in_dim, out_dim, hidden_dim = 8, 4, 32
    batch = 300  # deliberately not a multiple of the tile: exercises batch padding path

    key = jax.random.PRNGKey(0)
    kx, kp = jax.random.split(key)
    x = jax.random.normal(kx, (batch, in_dim), dtype=jnp.float32)
    params = init_params(kp, in_dim, out_dim, hidden_dim)

    out = fcnn_forward(x, params, batch_tile=256)   # Bp=512 -> grid of 2 programs
    out = jax.block_until_ready(out)

    ref = fcnn_reference(x, params)
    np.testing.assert_allclose(np.asarray(out), np.asarray(ref), rtol=1e-5, atol=1e-5)
    print("KERNEL_OK")
</pallas_src>

<mosaic_0001>
module attributes {stable_mosaic.version = 11 : i64} {
  func.func @fcnn_kernel(%arg0: i32, %arg1: memref<256x128xf32, #tpu.memory_space<vmem>>, %arg2: memref<128x128xf32, #tpu.memory_space<vmem>>, %arg3: memref<1x128xf32, #tpu.memory_space<vmem>>, %arg4: memref<128x128xf32, #tpu.memory_space<vmem>>, %arg5: memref<1x128xf32, #tpu.memory_space<vmem>>, %arg6: memref<128x128xf32, #tpu.memory_space<vmem>>, %arg7: memref<1x128xf32, #tpu.memory_space<vmem>>, %arg8: memref<256x128xf32, #tpu.memory_space<vmem>>) attributes {dimension_semantics = [#tpu.dimension_semantics<parallel>], iteration_bounds = array<i64: 2>, scalar_prefetch = 0 : i64, scratch_operands = 0 : i64, tpu.core_type = #tpu.core_type<tc>, window_params = [{transform_indices = @transform_0, window_bounds = array<i64: 256, 128>}, {pipeline_mode = #tpu.pipeline_mode<synchronous>, transform_indices = @transform_1, window_bounds = array<i64: 128, 128>}, {pipeline_mode = #tpu.pipeline_mode<synchronous>, transform_indices = @transform_2, window_bounds = array<i64: 1, 128>}, {pipeline_mode = #tpu.pipeline_mode<synchronous>, transform_indices = @transform_3, window_bounds = array<i64: 128, 128>}, {pipeline_mode = #tpu.pipeline_mode<synchronous>, transform_indices = @transform_4, window_bounds = array<i64: 1, 128>}, {pipeline_mode = #tpu.pipeline_mode<synchronous>, transform_indices = @transform_5, window_bounds = array<i64: 128, 128>}, {pipeline_mode = #tpu.pipeline_mode<synchronous>, transform_indices = @transform_6, window_bounds = array<i64: 1, 128>}, {transform_indices = @transform_7, window_bounds = array<i64: 256, 128>}]} {
    %c0 = arith.constant 0 : index
    %c0_0 = arith.constant 0 : index
    %0 = vector.load %arg1[%c0, %c0_0] : memref<256x128xf32, #tpu.memory_space<vmem>>, vector<256x128xf32>
    %c0_1 = arith.constant 0 : index
    %c0_2 = arith.constant 0 : index
    %1 = vector.load %arg2[%c0_1, %c0_2] : memref<128x128xf32, #tpu.memory_space<vmem>>, vector<128x128xf32>
    %cst = arith.constant dense<0.000000e+00> : vector<256x128xf32>
    %2 = tpu.matmul %0, %1, %cst {dimension_numbers = #tpu.dot_dimension_numbers<[1], [0], [0], [1], [0, 0, 1, 1], [], []>} : vector<256x128xf32>, vector<128x128xf32>, vector<256x128xf32> -> vector<256x128xf32>
    %c0_3 = arith.constant 0 : index
    %c0_4 = arith.constant 0 : index
    %3 = vector.load %arg3[%c0_3, %c0_4] : memref<1x128xf32, #tpu.memory_space<vmem>>, vector<1x128xf32>
    %4 = vector.broadcast %3 : vector<1x128xf32> to vector<256x128xf32>
    %5 = arith.addf %2, %4 : vector<256x128xf32>
    %6 = math.tanh %5 : vector<256x128xf32>
    %c0_5 = arith.constant 0 : index
    %c0_6 = arith.constant 0 : index
    %7 = vector.load %arg4[%c0_5, %c0_6] : memref<128x128xf32, #tpu.memory_space<vmem>>, vector<128x128xf32>
    %cst_7 = arith.constant dense<0.000000e+00> : vector<256x128xf32>
    %8 = tpu.matmul %6, %7, %cst_7 {dimension_numbers = #tpu.dot_dimension_numbers<[1], [0], [0], [1], [0, 0, 1, 1], [], []>} : vector<256x128xf32>, vector<128x128xf32>, vector<256x128xf32> -> vector<256x128xf32>
    %c0_8 = arith.constant 0 : index
    %c0_9 = arith.constant 0 : index
    %9 = vector.load %arg5[%c0_8, %c0_9] : memref<1x128xf32, #tpu.memory_space<vmem>>, vector<1x128xf32>
    %10 = vector.broadcast %9 : vector<1x128xf32> to vector<256x128xf32>
    %11 = arith.addf %8, %10 : vector<256x128xf32>
    %12 = math.tanh %11 : vector<256x128xf32>
    %c0_10 = arith.constant 0 : index
    %c0_11 = arith.constant 0 : index
    %13 = vector.load %arg6[%c0_10, %c0_11] : memref<128x128xf32, #tpu.memory_space<vmem>>, vector<128x128xf32>
    %cst_12 = arith.constant dense<0.000000e+00> : vector<256x128xf32>
    %14 = tpu.matmul %12, %13, %cst_12 {dimension_numbers = #tpu.dot_dimension_numbers<[1], [0], [0], [1], [0, 0, 1, 1], [], []>} : vector<256x128xf32>, vector<128x128xf32>, vector<256x128xf32> -> vector<256x128xf32>
    %c0_13 = arith.constant 0 : index
    %c0_14 = arith.constant 0 : index
    %15 = vector.load %arg7[%c0_13, %c0_14] : memref<1x128xf32, #tpu.memory_space<vmem>>, vector<1x128xf32>
    %16 = vector.broadcast %15 : vector<1x128xf32> to vector<256x128xf32>
    %17 = arith.addf %14, %16 : vector<256x128xf32>
    %c0_15 = arith.constant 0 : index
    %c0_16 = arith.constant 0 : index
    %18 = vector.load %arg8[%c0_15, %c0_16] : memref<256x128xf32, #tpu.memory_space<vmem>>, vector<256x128xf32>
    tpu.vector_store %arg8[%c0_15, %c0_16], %17 {strides = array<i32>} : memref<256x128xf32, #tpu.memory_space<vmem>>, vector<256x128xf32>,
    return
  }
  func.func @transform_0(%arg0: i32) -> (i32, i32) {
    %c0_i32 = arith.constant 0 : i32
    %c0_i32_0 = arith.constant 0 : i32
    return %arg0, %c0_i32 : i32, i32
  }
  func.func @transform_1(%arg0: i32) -> (i32, i32) {
    %c0_i32 = arith.constant 0 : i32
    %c0_i32_0 = arith.constant 0 : i32
    %c0_i32_1 = arith.constant 0 : i32
    return %c0_i32, %c0_i32_0 : i32, i32
  }
  func.func @transform_2(%arg0: i32) -> (i32, i32) {
    %c0_i32 = arith.constant 0 : i32
    %c0_i32_0 = arith.constant 0 : i32
    %c0_i32_1 = arith.constant 0 : i32
    return %c0_i32, %c0_i32_0 : i32, i32
  }
  func.func @transform_3(%arg0: i32) -> (i32, i32) {
    %c0_i32 = arith.constant 0 : i32
    %c0_i32_0 = arith.constant 0 : i32
    %c0_i32_1 = arith.constant 0 : i32
    return %c0_i32, %c0_i32_0 : i32, i32
  }
  func.func @transform_4(%arg0: i32) -> (i32, i32) {
    %c0_i32 = arith.constant 0 : i32
    %c0_i32_0 = arith.constant 0 : i32
    %c0_i32_1 = arith.constant 0 : i32
    return %c0_i32, %c0_i32_0 : i32, i32
  }
  func.func @transform_5(%arg0: i32) -> (i32, i32) {
    %c0_i32 = arith.constant 0 : i32
    %c0_i32_0 = arith.constant 0 : i32
    %c0_i32_1 = arith.constant 0 : i32
    return %c0_i32, %c0_i32_0 : i32, i32
  }
  func.func @transform_6(%arg0: i32) -> (i32, i32) {
    %c0_i32 = arith.constant 0 : i32
    %c0_i32_0 = arith.constant 0 : i32
    %c0_i32_1 = arith.constant 0 : i32
    return %c0_i32, %c0_i32_0 : i32, i32
  }
  func.func @transform_7(%arg0: i32) -> (i32, i32) {
    %c0_i32 = arith.constant 0 : i32
    %c0_i32_0 = arith.constant 0 : i32
    return %arg0, %c0_i32 : i32, i32
  }
}

</mosaic_0001>

<bundles_post_ra>
// kernel: tpu_custom_call.1
= control target key start
LH: loop header
LB: loop body
LE: loop exit
PB: predicated region body
PF: predicated region fallthrough
CT: control target
= control target key end

     0   :  { %12 = vsyncpa [#allocation3], 0  ;;  %s2797_s0 = inlined_call_operand.hbm [shape: f32[512,128], index: 0, kind: input, shape index: {}]   ;;  %s2798_s1 = inlined_call_operand.hbm [shape: f32[128,128], index: 1, kind: input, shape index: {}]   ;;  %s2799_s2 = inlined_call_operand.vmem [shape: f32[1,128], index: 2, kind: input, shape index: {}]   ;;  %s2800_s3 = inlined_call_operand.hbm [shape: f32[128,128], index: 3, kind: input, shape index: {}]   ;;  %s2801_s4 = inlined_call_operand.vmem [shape: f32[1,128], index: 4, kind: input, shape index: {}]   ;;  %s2802_s5 = inlined_call_operand.hbm [shape: f32[128,128], index: 5, kind: input, shape index: {}]   ;;  %s2803_s6 = inlined_call_operand.vmem [shape: f32[1,128], index: 6, kind: input, shape index: {}]   ;;  %s2804_s7 = inlined_call_operand.hbm [shape: f32[512,128], index: 7, kind: output, shape index: {}]  }
   0x1   :  { %14 = vsyncpa [#allocation3 + $0x1], 0 }
   0x2   :  { %15 = vsyncpa [#allocation6], 0 }
   0x3   :  { %16 = vsyncpa [#allocation9], 0 }
   0x4   :  { %17 = vsyncpa [#allocation4], 0 }
   0x5   :  { %19 = vsyncpa [#allocation4 + $0x1], 0  ;;  %s2300_s24 = smov 0   ;;  %s2302_s25 = smov 0  }
   0x6   :  { %s2304_s26 = smov 0   ;;  %s2306_s27 = smov 0  }
   0x7 LB: > { %s2321_s28 = sadd.s32 4294967295, %s2249_s27   ;;  %s1331_s29 = sadd.s32 4294967294, %s2249_s27   ;;  %s2249_s27 = sphi %s2306_s27, %s2830_s27   ;;  %s2245_s26 = sphi %s2304_s26, %s2829_s26   ;;  %s2241_s25 = sphi %s2302_s25, %s2828_s25   ;;  %s2237_s24 = sphi %s2300_s24, %s2827_s24  }
   0x8   : > { %p45_p0 = scmp.ne.s32.totalorder %s2241_s25, %s2237_s24  ;;  %p2805_p1 = scmp.eq.s32.totalorder %s2321_s28, 0 }
   0x9   : > { %p201_p3 = scmp.eq.s32.totalorder %s1331_s29, 1  ;;  %p1332_p5 = scmp.ge.s32.totalorder %s2249_s27, 1 }
   0xa   : > { %p2330_p4 = por %p2805_p1, %p45_p0  ;;  %p208_p7 = scmp.lt.s32.totalorder %s2249_s27, 3 }
   0xb   : > { %p2335_p6 = por %p201_p3, %p45_p0  ;;  %s2251_s10 = smov [#allocation5]  }
   0xc   : > { %s2809_s30 = scalar_select %p2330_p4, 1, 0 }
   0xd   : > { %s2810_s8 = scalar_select %p2335_p6, 1, 0 }
   0xe   : > { %p2340_p8 = pnand %p1332_p5, %p208_p7  ;;  %s220_s11 = sshll.u32 %s2251_s10, 4  ;;  %s2344_s11 = int_to_ptr.vmem [resolvable:$true] %s220_s11 }
   0xf   : > { %2811 = sst [smem:[#allocation15_spill]] %s2810_s8  ;;  %s2252_s13 = smov [#allocation7]  }
  0x10   : > { %s2812_s9 = scalar_select %p2340_p8, 1, 0 }
  0x11   : > { %p1868_p9 = pneg %p2340_p8  ;;  %s236_s14 = sshll.u32 %s2252_s13, 4  ;;  %s2355_s14 = int_to_ptr.vmem [resolvable:$true] %s236_s14 }
  0x12   : > { %s2253_s15 = smov [#allocation8]   ;;  %s2061_s19 = scalar_lea.hbm %s2798_s1, 2048 }
  0x13   : > { %p2351_p11 = pnand %p1868_p9, %p2805_p1  ;;  %s2357_s16 = sshll.u32 %s2253_s15, 4  ;;  %s253_s16 = int_to_ptr.vmem [resolvable:$true] %s2357_s16 }
  0x14   : > { %p2062_p12 = scmp.ne.s32.totalorder %s2798_s1, %s2061_s19  ;;  %p2068_p5 = scmp.lt.u32.totalorder %s2061_s19, %s2798_s1 }
  0x15   : > { %p2367_p13 = pneg %p2351_p11 }
  0x17   : > { %p2064_p0 = pnand %p2367_p13, %p2062_p12 }
  0x19   : > { %p2065_p3 = pneg %p2064_p0 }
  0x1b   : > { %p2070_p7 = pnand %p2068_p5, %p2065_p3 }
  0x1d   : > { %2073 = shalt.err (!%p2070_p7)
}
  0x1e   : > { %s2074_s10 = scalar_lea.vmem %s2344_s11, 2048  ;;  %p2082_p2 = scmp.lt.s32.totalorder %s2344_s11, %s2344_s11 }
  0x1f   : > { %p2075_p9 = scmp.ne.s32.totalorder %s2344_s11, %s2074_s10  ;;  %p2083_p6 = scmp.lt.s32.totalorder %s2074_s10, %s2074_s10 }
  0x21   : > { %p2077_p10 = pnand %p2075_p9, %p2367_p13  ;;  %p2084_p12 = por %p2083_p6, %p2082_p2 }
  0x23   : > { %p2078_p1 = pneg %p2077_p10 }
  0x25   : > { %p2085_p0 = pnand %p2084_p12, %p2078_p1 }
  0x27   : > { %2088 = shalt.err (!%p2085_p0)
}
  0x28   : > { %s2254_s13 = smov 128   ;;  %s2255_s15 = smov 8  }
  0x29   : > { %1871 = dma.hbm_to_vmem [thread:$0]  (!%p2351_p11), %s2798_s1, 2048, %s2344_s11, [#allocation6], %s2254_s13, %s2254_s13, %s2255_s15  }
  0x2a   : > { %s2089_s21 = scalar_lea.hbm %s2800_s3, 2048 }
  0x2b   : > { %p2090_p1 = scmp.ne.s32.totalorder %s2800_s3, %s2089_s21  ;;  %p2096_p10 = scmp.lt.u32.totalorder %s2089_s21, %s2800_s3 }
  0x2d   : > { %p2092_p2 = pnand %p2090_p1, %p2367_p13 }
  0x2f   : > { %p2093_p6 = pneg %p2092_p2 }
  0x31   : > { %p2098_p3 = pnand %p2096_p10, %p2093_p6 }
  0x33   : > { %2101 = shalt.err (!%p2098_p3)
}
  0x34   : > { %s2102_s11 = scalar_lea.vmem %s2355_s14, 2048  ;;  %p2110_p12 = scmp.lt.s32.totalorder %s2355_s14, %s2355_s14 }
  0x35   : > { %p2103_p5 = scmp.ne.s32.totalorder %s2355_s14, %s2102_s11  ;;  %p2111_p0 = scmp.lt.s32.totalorder %s2102_s11, %s2102_s11 }
  0x37   : > { %p2105_p7 = pnand %p2103_p5, %p2367_p13  ;;  %p2112_p1 = por %p2111_p0, %p2110_p12 }
  0x39   : > { %p2106_p9 = pneg %p2105_p7 }
  0x3b   : > { %p2113_p2 = pnand %p2112_p1, %p2106_p9 }
  0x3d   : > { %2116 = shalt.err (!%p2113_p2)
}
  0x3e   : > { %1874 = dma.hbm_to_vmem [thread:$0]  (!%p2351_p11), %s2800_s3, 2048, %s2355_s14, [#allocation6], %s2254_s13, %s2254_s13, %s2255_s15  }
  0x3f   : > { %s2117_s20 = scalar_lea.hbm %s2802_s5, 2048 }
  0x40   : > { %p2118_p6 = scmp.ne.s32.totalorder %s2802_s5, %s2117_s20  ;;  %p2124_p5 = scmp.lt.u32.totalorder %s2117_s20, %s2802_s5 }
  0x42   : > { %p2120_p10 = pnand %p2118_p6, %p2367_p13 }
  0x44   : > { %p2121_p3 = pneg %p2120_p10 }
  0x46   : > { %p2126_p7 = pnand %p2124_p5, %p2121_p3 }
  0x48   : > { %2129 = shalt.err (!%p2126_p7)
}
  0x49   : > { %s2130_s11 = scalar_lea.vmem %s253_s16, 2048  ;;  %p2138_p1 = scmp.lt.s32.totalorder %s253_s16, %s253_s16 }
  0x4a   : > { %p2131_p9 = scmp.ne.s32.totalorder %s253_s16, %s2130_s11  ;;  %p2139_p2 = scmp.lt.s32.totalorder %s2130_s11, %s2130_s11 }
  0x4c   : > { %p2133_p12 = pnand %p2131_p9, %p2367_p13  ;;  %p2140_p4 = por %p2139_p2, %p2138_p1 }
  0x4e   : > { %p2134_p0 = pneg %p2133_p12 }
  0x50   : > { %p2141_p8 = pnand %p2140_p4, %p2134_p0 }
  0x52   : > { %2144 = shalt.err (!%p2141_p8)
}
  0x53   : > { %1877 = dma.hbm_to_vmem [thread:$0]  (!%p2351_p11), %s2802_s5, 2048, %s253_s16, [#allocation9], %s2254_s13, %s2254_s13, %s2255_s15  }
  0x54   : > { %s2440_s22 = sadd.s32 1, %s2249_s27   ;;  %s32_s17 = sadd.s32 1, %s2245_s26 }
  0x55   : > { %s29_s12 = ssub.s32 %s2249_s27, %s2440_s22  ;;  %p39_p8 = scmp.ne.s32.totalorder %s2245_s26, %s2241_s25 }
  0x56   : > { %p30_p4 = scmp.eq.s32.totalorder %s29_s12, 0  ;;  %p40_p13 = scmp.eq.s32.totalorder %s2249_s27, 0 }
  0x57   : > { %p1889_p6 = scmp.lt.s32.totalorder %s2249_s27, 2  ;;  %p2815_p3 = scmp.eq.s32.totalorder %s2321_s28, 1 }
  0x58   : > { %s2450_s18 = scalar_select %p30_p4, %s2245_s26, %s32_s17  }
  0x59   : > { %p41_p10 = por %p40_p13, %p39_p8  ;;  %p2454_p5 = por %p2815_p3, %p39_p8 }
  0x5a   : > { %s269_s20 = sand.u32 1, %s2245_s26   ;;  %s1354_s21 = sshll.u32 %s2249_s27, 12 }
  0x5b   : > { %s1337_s16 = sshll.u32 %s269_s20, 8  ;;  %s2463_s10 = scalar_lea.hbm %s2797_s0, %s1354_s21 }
  0x5c   : > { %s273_s11 = scalar_lea.vmem [#allocation2], %s1337_s16  ;;  %p2465_p11 = pnand %p1889_p6, %p41_p10 }
  0x5d   : > { %s280_s14 = sshll.u32 %s273_s11, 4  ;;  %s2471_s12 = scalar_lea.sflag [#allocation3], %s269_s20  ;;  %s2469_s14 = int_to_ptr.vmem [resolvable:$true] %s280_s14 }
  0x5e   : > { %s2145_s17 = scalar_lea.hbm %s2463_s10, 4096  ;;  %p2147_p9 = pneg %p2465_p11 }
  0x5f   : > { %p2146_p7 = scmp.ne.s32.totalorder %s2463_s10, %s2145_s17  ;;  %s2150_s23 = scalar_lea.hbm %s2797_s0, 8192 }
  0x60   : > { %p2151_p1 = scmp.lt.u32.totalorder %s2463_s10, %s2797_s0  ;;  %p2152_p2 = scmp.lt.u32.totalorder %s2150_s23, %s2145_s17 }
  0x61   : > { %p2148_p12 = pnand %p2147_p9, %p2146_p7  ;;  %p2154_p8 = scmp.lt.u32.totalorder %s2145_s17, %s2463_s10 }
  0x62   : > { %p2153_p4 = por %p2152_p2, %p2151_p1 }
  0x63   : > { %p2149_p0 = pneg %p2148_p12 }
  0x64   : > { %p2155_p13 = por %p2154_p8, %p2153_p4 }
  0x66   : > { %p2156_p6 = pnand %p2155_p13, %p2149_p0 }
  0x68   : > { %2159 = shalt.err (!%p2156_p6)
}
  0x69   : > { %s2160_s20 = scalar_lea.vmem %s2469_s14, 4096  ;;  %s2256_s21 = smov [#allocation2]  }
  0x6a   : > { %p2161_p10 = scmp.ne.s32.totalorder %s2469_s14, %s2160_s20  ;;  %s2165_s16 = sshll.u32 %s2256_s21, 4  ;;  %s2166_s16 = int_to_ptr.vmem [resolvable:$false] %s2165_s16 }
  0x6b   : > { %s2167_s29 = scalar_lea.vmem %s2166_s16, 8192  ;;  %p2168_p12 = scmp.lt.s32.totalorder %s2469_s14, %s2166_s16 }
  0x6c   : > { %p2163_p3 = pnand %p2161_p10, %p2147_p9  ;;  %p2169_p1 = scmp.lt.s32.totalorder %s2167_s29, %s2160_s20 }
  0x6e   : > { %p2164_p7 = pneg %p2163_p3  ;;  %p2170_p2 = por %p2169_p1, %p2168_p12 }
  0x70   : > { %p2171_p4 = pnand %p2170_p2, %p2164_p7 }
  0x72   : > { %2174 = shalt.err (!%p2171_p4)
}
  0x73   : > { %1881 = dma.hbm_to_vmem [thread:$0]  (!%p2465_p11), %s2463_s10, 4096, %s2469_s14, %s2471_s12, %s2254_s13, %s2254_s13, %s2255_s15  }
  0x74   : > { %p2818_p9 = scmp.ne.s32.totalorder %s2812_s9, 0 }
  0x75   : > { %s2505_s17 = sand.u32 (!%p2818_p9), 1, %s2241_s25   ;;  %p2819_p0 = scmp.ne.s32.totalorder (!%p2818_p9), %s2809_s30, 0 }
  0x76   : > { %292 = sbr.rel (%p2818_p9) target bundleno = 912 (0x390), region = 48  ;;  %s1341_s23 = sshll.u32 (!%p2818_p9), %s2505_s17, 8 }
  0x77   : > { %s295_s11 = scalar_lea.sflag (!%p2818_p9), [#allocation3], %s2505_s17  ;;  %s2511_s8 = scalar_lea.vmem (!%p2818_p9), [#allocation2], %s1341_s23 }
  0x7d   : > { %2220 = dma.done.wait (%p2819_p0), %s295_s11, 4096  }
  0x7e   : > { %2222 = vsyncadd (%p2819_p0), %s295_s11, 4294963200  ;;  %p2820_p11 = scmp.eq.s32.totalorder %s2321_s28, 0 }
  0x80   : > { %2224 = dma.done.wait (%p2820_p11), [#allocation6], 4096   ;;  %p2821_p8 = pmov %p2820_p11 }
  0x82   : > { %2226 = vsyncadd (%p2821_p8), [#allocation6], 4294963200  ;;  %p2822_p13 = pmov %p2821_p8 }
  0x83   : > { %p2823_p6 = pmov %p2821_p8 }
  0x84   : > { %2228 = dma.done.wait (%p2822_p13), [#allocation9], 2048  }
  0x85   : > { %2230 = vsyncadd (%p2823_p6), [#allocation9], 4294965248  ;;  %v375_v0 = vld [vmem:[#allocation5] sm:$0xff]  ;;  %v376_v1 = vld [vmem:[#allocation5 + $0x8] sm:$0xff]  ;;  %s2682_s12 = scalar_lea.vmem [#allocation10], %s1341_s23  ;;  %s1355_s20 = sshll.u32 %s2321_s28, 12 }
  0x86   : > { %v377_v2 = vld [vmem:[#allocation5 + $0x10] sm:$0xff]  ;;  %v1740_v3 = vpack.c.bf16 %v376_v1, %v375_v0  ;;  %v378_v4 = vld [vmem:[#allocation5 + $0x18] sm:$0xff]  ;;  %v379_v6 = vld [vmem:[#allocation5 + $0x20] sm:$0xff]  ;;  %s1229_s21 = sshll.u32 %s2682_s12, 4  ;;  %s2748_s23 = scalar_lea.hbm %s2804_s7, %s1355_s20  ;;  %s2750_s21 = int_to_ptr.vmem [resolvable:$true] %s1229_s21 }
  0x87   : > { %v1744_v5 = vpack.c.bf16 %v378_v4, %v377_v2  ;;  %v380_v7 = vld [vmem:[#allocation5 + $0x28] sm:$0xff]  ;;  %v343_v9 = vld [vmem:[%s2511_s8] sm:$0xff]  ;;  %v381_v10 = vld [vmem:[#allocation5 + $0x30] sm:$0xff]  ;;  %s1216_s28 = scalar_lea.sflag [#allocation4], %s2505_s17  ;;  %s2175_s11 = scalar_lea.vmem %s2750_s21, 4096 }
  0x88   : > { %1741 = vmatprep.subr.bf16.mxu0 %v1740_v3  ;;  %1836 = vmatprep.subr.bf16.mxu1 %v1740_v3  ;;  %v1748_v8 = vpack.c.bf16 %v380_v7, %v379_v6  ;;  %v382_v11 = vld [vmem:[#allocation5 + $0x38] sm:$0xff]  ;;  %v383_v13 = vld [vmem:[#allocation5 + $0x40] sm:$0xff]  ;;  %v384_v14 = vld [vmem:[#allocation5 + $0x48] sm:$0xff]  ;;  %p2176_p10 = scmp.ne.s32.totalorder %s2750_s21, %s2175_s11 }
  0x89   : > { %1743 = vmatpush3.bf16.msra.mxu0 %v1740_v3  ;;  %1844 = vmatpush3.bf16.msra.mxu1 %v1740_v3  ;;  %v1752_v12 = vpack.c.bf16 %v382_v11, %v381_v10  ;;  %v359_v15 = vld [vmem:[%s2511_s8 + $0x80] sm:$0xff]  ;;  %v1756_v16 = vpack.c.bf16 %v384_v14, %v383_v13  ;;  %v385_v17 = vld [vmem:[#allocation5 + $0x50] sm:$0xff]  ;;  %v386_v18 = vld [vmem:[#allocation5 + $0x58] sm:$0xff] }
  0x8a   : > { %1745 = vmatprep.subr.bf16.mxu0 %v1744_v5  ;;  %1837 = vmatprep.subr.bf16.mxu1 %v1744_v5  ;;  %v1760_v19 = vpack.c.bf16 %v386_v18, %v385_v17  ;;  %v387_v20 = vld [vmem:[#allocation5 + $0x60] sm:$0xff]  ;;  %v388_v21 = vld [vmem:[#allocation5 + $0x68] sm:$0xff]  ;;  %v389_v23 = vld [vmem:[#allocation5 + $0x70] sm:$0xff]  ;;  %p2177_p3 = pnand %p2176_p10, %p2454_p5 }
  0x8b   : > { %1532 = vmatprep.mubr.f32.mxu0 %v343_v9  ;;  %1556 = vmatprep.mubr.f32.mxu1 %v359_v15  ;;  %v1764_v22 = vpack.c.bf16 %v388_v21, %v387_v20  ;;  %v390_v24 = vld [vmem:[#allocation5 + $0x78] sm:$0xff]  ;;  %v655_v26 = vld [vmem:[#allocation7] sm:$0xff]  ;;  %v656_v27 = vld [vmem:[#allocation7 + $0x8] sm:$0xff] }
  0x8c   : > { %v1768_v25 = vpack.c.bf16 %v390_v24, %v389_v23  ;;  %v1772_v28 = vpack.c.bf16 %v656_v27, %v655_v26  ;;  %v657_v29 = vld [vmem:[#allocation7 + $0x10] sm:$0xff]  ;;  %v658_v30 = vld [vmem:[#allocation7 + $0x18] sm:$0xff]  ;;  %v344_v31 = vld [vmem:[%s2511_s8 + $0x8] sm:$0xff]  ;;  %p2178_p7 = pneg %p2177_p3 }
  0x8d   : > { %1747 = vmatpush3.bf16.msra.mxu0 %v1744_v5  ;;  %1845 = vmatpush3.bf16.msra.mxu1 %v1744_v5  ;;  %v360_v32 = vld [vmem:[%s2511_s8 + $0x88] sm:$0xff]  ;;  %v345_v33 = vld [vmem:[%s2511_s8 + $0x10] sm:$0xff]  ;;  %v1776_v35 = vpack.c.bf16 %v658_v30, %v657_v29  ;;  %v659_v36 = vld [vmem:[#allocation7 + $0x20] sm:$0xff] }
  0x8e   : > { %1749 = vmatprep.subr.bf16.mxu0 %v1748_v8  ;;  %1838 = vmatprep.subr.bf16.mxu1 %v1748_v8  ;;  %v361_v34 = vld [vmem:[%s2511_s8 + $0x90] sm:$0xff]  ;;  %v660_v37 = vld [vmem:[#allocation7 + $0x28] sm:$0xff]  ;;  %v346_v38 = vld [vmem:[%s2511_s8 + $0x18] sm:$0xff] }
  0x8f   : > { %v362_v39 = vld [vmem:[%s2511_s8 + $0x98] sm:$0xff]  ;;  %v347_v40 = vld [vmem:[%s2511_s8 + $0x20] sm:$0xff]  ;;  %v1780_v42 = vpack.c.bf16 %v660_v37, %v659_v36  ;;  %v661_v43 = vld [vmem:[#allocation7 + $0x30] sm:$0xff] }
  0x90   : > { %v363_v41 = vld [vmem:[%s2511_s8 + $0xa0] sm:$0xff]  ;;  %v662_v44 = vld [vmem:[#allocation7 + $0x38] sm:$0xff]  ;;  %v348_v45 = vld [vmem:[%s2511_s8 + $0x28] sm:$0xff] }
  0x91   : > { %1751 = vmatpush3.bf16.msra.mxu0 %v1748_v8  ;;  %1846 = vmatpush3.bf16.msra.mxu1 %v1748_v8  ;;  %v364_v46 = vld [vmem:[%s2511_s8 + $0xa8] sm:$0xff]  ;;  %v349_v47 = vld [vmem:[%s2511_s8 + $0x30] sm:$0xff]  ;;  %v1784_v49 = vpack.c.bf16 %v662_v44, %v661_v43  ;;  %v663_v50 = vld [vmem:[#allocation7 + $0x40] sm:$0xff] }
  0x92   : > { %1753 = vmatprep.subr.bf16.mxu0 %v1752_v12  ;;  %1839 = vmatprep.subr.bf16.mxu1 %v1752_v12  ;;  %v365_v48 = vld [vmem:[%s2511_s8 + $0xb0] sm:$0xff]  ;;  %v664_v51 = vld [vmem:[#allocation7 + $0x48] sm:$0xff]  ;;  %v350_v52 = vld [vmem:[%s2511_s8 + $0x38] sm:$0xff] }
  0x93   : > { %v366_v53 = vld [vmem:[%s2511_s8 + $0xb8] sm:$0xff]  ;;  %v351_v54 = vld [vmem:[%s2511_s8 + $0x40] sm:$0xff]  ;;  %v1788_v56 = vpack.c.bf16 %v664_v51, %v663_v50  ;;  %v352_v57 = vld [vmem:[%s2511_s8 + $0x48] sm:$0xff] }
  0x94   : > { %v367_v55 = vld [vmem:[%s2511_s8 + $0xc0] sm:$0xff]  ;;  %v368_v58 = vld [vmem:[%s2511_s8 + $0xc8] sm:$0xff]  ;;  %v353_v59 = vld [vmem:[%s2511_s8 + $0x50] sm:$0xff] }
  0x95   : > { %1755 = vmatpush3.bf16.msra.mxu0 %v1752_v12  ;;  %1847 = vmatpush3.bf16.msra.mxu1 %v1752_v12  ;;  %v369_v60 = vld [vmem:[%s2511_s8 + $0xd0] sm:$0xff]  ;;  %v354_v61 = vld [vmem:[%s2511_s8 + $0x58] sm:$0xff]  ;;  %v355_v63 = vld [vmem:[%s2511_s8 + $0x60] sm:$0xff] }
  0x96   : > { %1757 = vmatprep.subr.bf16.mxu0 %v1756_v16  ;;  %1840 = vmatprep.subr.bf16.mxu1 %v1756_v16  ;;  %v370_v62 = vld [vmem:[%s2511_s8 + $0xd8] sm:$0xff]  ;;  %v371_v0 = vld [vmem:[%s2511_s8 + $0xe0] sm:$0xff]  ;;  %v356_v1 = vld [vmem:[%s2511_s8 + $0x68] sm:$0xff] }
  0x97   : > { %v372_v2 = vld [vmem:[%s2511_s8 + $0xe8] sm:$0xff]  ;;  %v357_v3 = vld [vmem:[%s2511_s8 + $0x70] sm:$0xff]  ;;  %v358_v5 = vld [vmem:[%s2511_s8 + $0x78] sm:$0xff] }
  0x98   : > { %v373_v4 = vld [vmem:[%s2511_s8 + $0xf0] sm:$0xff]  ;;  %v374_v6 = vld [vmem:[%s2511_s8 + $0xf8] sm:$0xff]  ;;  %v667_v10 = vld [vmem:[#allocation7 + $0x60] sm:$0xff]  ;;  %s2257_s8 = smov [#allocation10]  }
  0x99   : > { %1759 = vmatpush3.bf16.msra.mxu0 %v1756_v16  ;;  %1848 = vmatpush3.bf16.msra.mxu1 %v1756_v16  ;;  %v665_v7 = vld [vmem:[#allocation7 + $0x50] sm:$0xff]  ;;  %v666_v8 = vld [vmem:[#allocation7 + $0x58] sm:$0xff]  ;;  %v668_v11 = vld [vmem:[#allocation7 + $0x68] sm:$0xff]  ;;  %s2179_s30 = sshll.u32 %s2257_s8, 4  ;;  %s2180_s30 = int_to_ptr.vmem [resolvable:$false] %s2179_s30 }
  0x9a   : > { %1761 = vmatprep.subr.bf16.mxu0 %v1760_v19  ;;  %1841 = vmatprep.subr.bf16.mxu1 %v1760_v19  ;;  %v1792_v9 = vpack.c.bf16 %v666_v8, %v665_v7  ;;  %v1796_v12 = vpack.c.bf16 %v668_v11, %v667_v10  ;;  %v669_v13 = vld [vmem:[#allocation7 + $0x70] sm:$0xff]  ;;  %v670_v14 = vld [vmem:[#allocation7 + $0x78] sm:$0xff]  ;;  %v935_v16 = vld [vmem:[#allocation8] sm:$0xff]  ;;  %s2181_s9 = scalar_lea.vmem %s2180_s30, 8192  ;;  %p2182_p12 = scmp.lt.s32.totalorder %s2750_s21, %s2180_s30 }
  0x9b   : > { %v1800_v15 = vpack.c.bf16 %v670_v14, %v669_v13  ;;  %v936_v17 = vld [vmem:[#allocation8 + $0x8] sm:$0xff]  ;;  %v937_v18 = vld [vmem:[#allocation8 + $0x10] sm:$0xff]  ;;  %v938_v20 = vld [vmem:[#allocation8 + $0x18] sm:$0xff]  ;;  %p2183_p1 = scmp.lt.s32.totalorder %s2181_s9, %s2175_s11 }
  0x9c   : > { %v1808_v21 = vpack.c.bf16 %v938_v20, %v937_v18  ;;  %v940_v23 = vld [vmem:[#allocation8 + $0x28] sm:$0xff]  ;;  %v942_v26 = vld [vmem:[#allocation8 + $0x38] sm:$0xff] }
  0x9d   : > { %1763 = vmatpush3.bf16.msra.mxu0 %v1760_v19  ;;  %1849 = vmatpush3.bf16.msra.mxu1 %v1760_v19  ;;  %v1804_v19 = vpack.c.bf16 %v936_v17, %v935_v16  ;;  %v944_v29 = vld [vmem:[#allocation8 + $0x48] sm:$0xff]  ;;  %p2184_p2 = por %p2183_p1, %p2182_p12 }
  0x9e   : > { %1765 = vmatprep.subr.bf16.mxu0 %v1764_v22  ;;  %1842 = vmatprep.subr.bf16.mxu1 %v1764_v22 }
  0x9f   : > { %p2185_p4 = pnand %p2184_p2, %p2178_p7 }
  0xa1   : > { %1767 = vmatpush3.bf16.msra.mxu0 %v1764_v22  ;;  %1850 = vmatpush3.bf16.msra.mxu1 %v1764_v22  ;;  %v939_v22 = vld [vmem:[#allocation8 + $0x20] sm:$0xff] }
  0xa2   : > { %1769 = vmatprep.subr.bf16.mxu0 %v1768_v25  ;;  %1843 = vmatprep.subr.bf16.mxu1 %v1768_v25  ;;  %v1812_v24 = vpack.c.bf16 %v940_v23, %v939_v22 }
  0xa5   : > { %1771 = vmatpush3.bf16.msra.mxu0 %v1768_v25  ;;  %1851 = vmatpush3.bf16.msra.mxu1 %v1768_v25  ;;  %v941_v25 = vld [vmem:[#allocation8 + $0x30] sm:$0xff] }
  0xa6   : > { %1773 = vmatprep.subr.bf16.mxu1 %v1772_v28  ;;  %1805 = vmatprep.subr.bf16.mxu0 %v1804_v19  ;;  %v1816_v27 = vpack.c.bf16 %v942_v26, %v941_v25 }
  0xa8   : > { %1533 = vmatmul.mubr.f32.vlgmr.msra.gmra.mrb[0].mxu0 %v344_v31  ;;  %1557 = vmatmul.mubr.f32.vlgmr.msra.gmra.mrb[0].mxu1 %v360_v32  ;;  %v2560_v31 = vld [vmem:[%s2799_s2] ss:$0 sm:$0xff] }
  0xa9   : > { %1535 = vmatprep.mubr.f32.mxu0 %v345_v33  ;;  %1559 = vmatprep.mubr.f32.mxu1 %v361_v34 }
  0xaa   : > { %1775 = vmatpush3.bf16.msra.mxu1 %v1772_v28  ;;  %1807 = vmatpush3.bf16.msra.mxu0 %v1804_v19  ;;  %v943_v28 = vld [vmem:[#allocation8 + $0x40] sm:$0xff] }
  0xab   : > { %1777 = vmatprep.subr.bf16.mxu1 %v1776_v35  ;;  %1809 = vmatprep.subr.bf16.mxu0 %v1808_v21  ;;  %v1820_v30 = vpack.c.bf16 %v944_v29, %v943_v28 }
  0xac   : > { %1536 = vmatmul.mubr.f32.gmra.mrb[2].mxu0 %v346_v38  ;;  %1560 = vmatmul.mubr.f32.gmra.mrb[2].mxu1 %v362_v39 }
  0xad   : > { %1538 = vmatprep.mubr.f32.mxu0 %v347_v40  ;;  %1562 = vmatprep.mubr.f32.mxu1 %v363_v41 }
  0xae   : > { %1779 = vmatpush3.bf16.msra.mxu1 %v1776_v35  ;;  %1811 = vmatpush3.bf16.msra.mxu0 %v1808_v21 }
  0xaf   : > { %1781 = vmatprep.subr.bf16.mxu1 %v1780_v42  ;;  %1813 = vmatprep.subr.bf16.mxu0 %v1812_v24 }
  0xb0   : > { %1539 = vmatmul.mubr.f32.gmra.mrb[4].mxu0 %v348_v45  ;;  %1563 = vmatmul.mubr.f32.gmra.mrb[4].mxu1 %v364_v46 }
  0xb1   : > { %1541 = vmatprep.mubr.f32.mxu0 %v349_v47  ;;  %1565 = vmatprep.mubr.f32.mxu1 %v365_v48 }
  0xb2   : > { %1783 = vmatpush3.bf16.msra.mxu1 %v1780_v42  ;;  %1815 = vmatpush3.bf16.msra.mxu0 %v1812_v24 }
  0xb3   : > { %1785 = vmatprep.subr.bf16.mxu1 %v1784_v49  ;;  %1817 = vmatprep.subr.bf16.mxu0 %v1816_v27 }
  0xb4   : > { %1542 = vmatmul.mubr.f32.gmra.mrb[6].mxu0 %v350_v52  ;;  %1566 = vmatmul.mubr.f32.gmra.mrb[6].mxu1 %v366_v53 }
  0xb5   : > { %1544 = vmatprep.mubr.f32.mxu0 %v351_v54  ;;  %1568 = vmatprep.mubr.f32.mxu1 %v367_v55 }
  0xb6   : > { %1787 = vmatpush3.bf16.msra.mxu1 %v1784_v49  ;;  %1819 = vmatpush3.bf16.msra.mxu0 %v1816_v27 }
  0xb7   : > { %1789 = vmatprep.subr.bf16.mxu1 %v1788_v56  ;;  %1821 = vmatprep.subr.bf16.mxu0 %v1820_v30 }
  0xb8   : > { %1545 = vmatmul.mubr.f32.gmra.mrb[8].mxu0 %v352_v57  ;;  %1569 = vmatmul.mubr.f32.gmra.mrb[8].mxu1 %v368_v58 }
  0xb9   : > { %1547 = vmatprep.mubr.f32.mxu0 %v353_v59  ;;  %1571 = vmatprep.mubr.f32.mxu1 %v369_v60 }
  0xba   : > { %1791 = vmatpush3.bf16.msra.mxu1 %v1788_v56  ;;  %1823 = vmatpush3.bf16.msra.mxu0 %v1820_v30 }
  0xbb   : > { %1793 = vmatprep.subr.bf16.mxu1 %v1792_v9 }
  0xbc   : > { %1548 = vmatmul.mubr.f32.gmra.mrb[10].mxu0 %v354_v61  ;;  %1572 = vmatmul.mubr.f32.gmra.mrb[10].mxu1 %v370_v62 }
  0xbd   : > { %1550 = vmatprep.mubr.f32.mxu0 %v355_v63  ;;  %1574 = vmatprep.mubr.f32.mxu1 %v371_v0 }
  0xbe   : > { %1795 = vmatpush3.bf16.msra.mxu1 %v1792_v9 }
  0xbf   : > { %1797 = vmatprep.subr.bf16.mxu1 %v1796_v12 }
  0xc0   : > { %1551 = vmatmul.mubr.f32.gmra.mrb[12].mxu0 %v356_v1  ;;  %1575 = vmatmul.mubr.f32.gmra.mrb[12].mxu1 %v372_v2 }
  0xc1   : > { %1553 = vmatprep.mubr.f32.mxu0 %v357_v3  ;;  %1577 = vmatprep.mubr.f32.mxu1 %v373_v4 }
  0xc2   : > { %1799 = vmatpush3.bf16.msra.mxu1 %v1796_v12 }
  0xc3   : > { %1801 = vmatprep.subr.bf16.mxu1 %v1800_v15 }
  0xc4   : > { %1554 = vmatmul.mubr.f32.gmra.mrb[14].mxu0 %v358_v5  ;;  %1578 = vmatmul.mubr.f32.gmra.mrb[14].mxu1 %v374_v6 }
  0xc6   : > { %1803 = vmatpush3.bf16.msra.mxu1 %v1800_v15 }
 0x17b   : > { %v1534_v32 = vpop.f32.mrb[0].mxu0  ;;  %v2562_v33 = vpop.f32.mrb[0].mxu1 }
 0x17c   : > { %v470_v34 = vadd.f32 %v1534_v32, %v2560_v31  ;;  %v464_v35 = vpop.f32.mrb[1].mxu0  ;;  %v2565_v36 = vpop.f32.mrb[1].mxu1  ;;  %v550_v28 = vadd.f32 %v2562_v33, %v2560_v31 }
 0x17d   : > { %v465_v37 = vadd.f32 %v2560_v31, %v464_v35  ;;  %v545_v18 = vadd.f32 %v2560_v31, %v2565_v36 }
 0x17f   : > { %1933 = vtanh.f32 %v465_v37  ;;  %v1537_v38 = vpop.f32.mrb[2].mxu0  ;;  %v2568_v39 = vpop.f32.mrb[2].mxu1 }
 0x180   : > { %1935 = vtanh.f32 %v470_v34  ;;  %v480_v40 = vadd.f32 %v1537_v38, %v2560_v31  ;;  %v474_v41 = vpop.f32.mrb[3].mxu0  ;;  %v2571_v42 = vpop.f32.mrb[3].mxu1  ;;  %v560_v34 = vadd.f32 %v2568_v39, %v2560_v31 }
 0x181   : > { %v475_v43 = vadd.f32 %v2560_v31, %v474_v41  ;;  %v555_v27 = vadd.f32 %v2560_v31, %v2571_v42 }
 0x183   : > { %1937 = vtanh.f32 %v475_v43  ;;  %v1540_v44 = vpop.f32.mrb[4].mxu0  ;;  %v2574_v45 = vpop.f32.mrb[4].mxu1 }
 0x184   : > { %1939 = vtanh.f32 %v480_v40  ;;  %v490_v46 = vadd.f32 %v1540_v44, %v2560_v31  ;;  %v484_v47 = vpop.f32.mrb[5].mxu0  ;;  %v2577_v48 = vpop.f32.mrb[5].mxu1  ;;  %v570_v38 = vadd.f32 %v2574_v45, %v2560_v31 }
 0x185   : > { %v485_v49 = vadd.f32 %v2560_v31, %v484_v47  ;;  %v565_v32 = vadd.f32 %v2560_v31, %v2577_v48 }
 0x187   : > { %1941 = vtanh.f32 %v485_v49  ;;  %v1543_v50 = vpop.f32.mrb[6].mxu0  ;;  %v2580_v51 = vpop.f32.mrb[6].mxu1 }
 0x188   : > { %1943 = vtanh.f32 %v490_v46  ;;  %v500_v52 = vadd.f32 %v1543_v50, %v2560_v31  ;;  %v494_v53 = vpop.f32.mrb[7].mxu0  ;;  %v2583_v54 = vpop.f32.mrb[7].mxu1  ;;  %v580_v42 = vadd.f32 %v2580_v51, %v2560_v31 }
 0x189   : > { %v1934_v55 = vpop.eup %1933  ;;  %v495_v56 = vadd.f32 %v2560_v31, %v494_v53  ;;  %v575_v33 = vadd.f32 %v2560_v31, %v2583_v54 }
 0x18a   : > { %v1936_v57 = vpop.eup %1935  ;;  %1612 = vmatprep.mubr.f32.mxu1 %v1934_v55 }
 0x18b   : > { %1945 = vtanh.f32 %v495_v56  ;;  %v1546_v58 = vpop.f32.mrb[8].mxu0  ;;  %1613 = vmatmul.mubr.f32.vlgmr.msra.gmra.mrb[16].mxu1 %v1936_v57  ;;  %v2586_v59 = vpop.f32.mrb[8].mxu1 }
 0x18c   : > { %1947 = vtanh.f32 %v500_v52  ;;  %v510_v60 = vadd.f32 %v1546_v58, %v2560_v31  ;;  %v504_v61 = vpop.f32.mrb[9].mxu0  ;;  %v2589_v62 = vpop.f32.mrb[9].mxu1  ;;  %v590_v46 = vadd.f32 %v2586_v59, %v2560_v31 }
 0x18d   : > { %v1938_v63 = vpop.eup %1937  ;;  %v505_v0 = vadd.f32 %v2560_v31, %v504_v61  ;;  %v585_v39 = vadd.f32 %v2560_v31, %v2589_v62 }
 0x18e   : > { %v1940_v1 = vpop.eup %1939  ;;  %1615 = vmatprep.mubr.f32.mxu1 %v1938_v63 }
 0x18f   : > { %1949 = vtanh.f32 %v505_v0  ;;  %v1549_v2 = vpop.f32.mrb[10].mxu0  ;;  %1616 = vmatmul.mubr.f32.gmra.mrb[18].mxu1 %v1940_v1  ;;  %v2592_v3 = vpop.f32.mrb[10].mxu1  ;;  %v945_v1 = vld [vmem:[#allocation8 + $0x50] sm:$0xff] }
 0x190   : > { %1951 = vtanh.f32 %v510_v60  ;;  %v520_v4 = vadd.f32 %v1549_v2, %v2560_v31  ;;  %v514_v5 = vpop.f32.mrb[11].mxu0  ;;  %v2595_v6 = vpop.f32.mrb[11].mxu1  ;;  %v600_v50 = vadd.f32 %v2592_v3, %v2560_v31  ;;  %v946_v2 = vld [vmem:[#allocation8 + $0x58] sm:$0xff] }
 0x191   : > { %v1942_v7 = vpop.eup %1941  ;;  %v515_v8 = vadd.f32 %v2560_v31, %v514_v5  ;;  %v595_v45 = vadd.f32 %v2560_v31, %v2595_v6  ;;  %v1824_v3 = vpack.c.bf16 %v946_v2, %v945_v1  ;;  %v949_v6 = vld [vmem:[#allocation8 + $0x70] sm:$0xff] }
 0x192   : > { %v1944_v9 = vpop.eup %1943  ;;  %1618 = vmatprep.mubr.f32.mxu1 %v1942_v7  ;;  %v950_v7 = vld [vmem:[#allocation8 + $0x78] sm:$0xff] }
 0x193   : > { %1953 = vtanh.f32 %v515_v8  ;;  %v1552_v10 = vpop.f32.mrb[12].mxu0  ;;  %1619 = vmatmul.mubr.f32.gmra.mrb[20].mxu1 %v1944_v9  ;;  %v2598_v11 = vpop.f32.mrb[12].mxu1  ;;  %1825 = vmatprep.subr.bf16.mxu0 %v1824_v3  ;;  %v1832_v8 = vpack.c.bf16 %v950_v7, %v949_v6  ;;  %v2639_v9 = vld [vmem:[%s2801_s4] ss:$0 sm:$0xff] }
 0x194   : > { %1955 = vtanh.f32 %v520_v4  ;;  %v530_v12 = vadd.f32 %v1552_v10, %v2560_v31  ;;  %v524_v13 = vpop.f32.mrb[13].mxu0  ;;  %v604_v14 = vpop.f32.mrb[13].mxu1  ;;  %v610_v54 = vadd.f32 %v2598_v11, %v2560_v31  ;;  %1827 = vmatpush3.bf16.msra.mxu0 %v1824_v3  ;;  %v948_v4 = vld [vmem:[#allocation8 + $0x68] sm:$0xff] }
 0x195   : > { %v1946_v15 = vpop.eup %1945  ;;  %v525_v16 = vadd.f32 %v2560_v31, %v524_v13  ;;  %v605_v49 = vadd.f32 %v2560_v31, %v604_v14 }
 0x196   : > { %v1948_v17 = vpop.eup %1947  ;;  %1621 = vmatprep.mubr.f32.mxu1 %v1946_v15 }
 0x197   : > { %1957 = vtanh.f32 %v525_v16  ;;  %v1555_v19 = vpop.f32.mrb[14].mxu0  ;;  %1622 = vmatmul.mubr.f32.gmra.mrb[22].mxu1 %v1948_v17  ;;  %v2604_v20 = vpop.f32.mrb[14].mxu1 }
 0x198   : > { %1959 = vtanh.f32 %v530_v12  ;;  %v540_v21 = vadd.f32 %v1555_v19, %v2560_v31  ;;  %v534_v22 = vpop.f32.mrb[15].mxu0  ;;  %v614_v23 = vpop.f32.mrb[15].mxu1  ;;  %v620_v57 = vadd.f32 %v2604_v20, %v2560_v31 }
 0x199   : > { %v1950_v24 = vpop.eup %1949  ;;  %v535_v25 = vadd.f32 %v2560_v31, %v534_v22  ;;  %1961 = vtanh.f32 %v545_v18  ;;  %v615_v53 = vadd.f32 %v2560_v31, %v614_v23  ;;  %v947_v31 = vld [vmem:[#allocation8 + $0x60] sm:$0xff] }
 0x19a   : > { %v1952_v26 = vpop.eup %1951  ;;  %1624 = vmatprep.mubr.f32.mxu1 %v1950_v24  ;;  %v1828_v5 = vpack.c.bf16 %v948_v4, %v947_v31 }
 0x19b   : > { %1963 = vtanh.f32 %v535_v25  ;;  %1625 = vmatmul.mubr.f32.gmra.mrb[24].mxu1 %v1952_v26 }
 0x19c   : > { %1965 = vtanh.f32 %v540_v21  ;;  %1829 = vmatprep.subr.bf16.mxu0 %v1828_v5 }
 0x19d   : > { %v1954_v29 = vpop.eup %1953  ;;  %1967 = vtanh.f32 %v555_v27  ;;  %1831 = vmatpush3.bf16.msra.mxu0 %v1828_v5 }
 0x19e   : > { %v1956_v30 = vpop.eup %1955  ;;  %1627 = vmatprep.mubr.f32.mxu1 %v1954_v29  ;;  %1969 = vtanh.f32 %v550_v28  ;;  %1833 = vmatprep.subr.bf16.mxu0 %v1832_v8 }
 0x19f   : > { %1628 = vmatmul.mubr.f32.gmra.mrb[26].mxu1 %v1956_v30  ;;  %1971 = vtanh.f32 %v565_v32 }
 0x1a0   : > { %1973 = vtanh.f32 %v560_v34 }
 0x1a1   : > { %v1958_v35 = vpop.eup %1957  ;;  %1975 = vtanh.f32 %v575_v33  ;;  %1835 = vmatpush3.bf16.msra.mxu0 %v1832_v8 }
 0x1a2   : > { %v1960_v36 = vpop.eup %1959  ;;  %1630 = vmatprep.mubr.f32.mxu1 %v1958_v35  ;;  %1977 = vtanh.f32 %v570_v38 }
 0x1a3   : > { %1631 = vmatmul.mubr.f32.gmra.mrb[28].mxu1 %v1960_v36  ;;  %v1962_v37 = vpop.eup %1961  ;;  %1979 = vtanh.f32 %v585_v39 }
 0x1a4   : > { %1981 = vtanh.f32 %v580_v42 }
 0x1a5   : > { %v1964_v40 = vpop.eup %1963  ;;  %1983 = vtanh.f32 %v595_v45 }
 0x1a6   : > { %v1966_v41 = vpop.eup %1965  ;;  %1633 = vmatprep.mubr.f32.mxu1 %v1964_v40  ;;  %1985 = vtanh.f32 %v590_v46 }
 0x1a7   : > { %1634 = vmatmul.mubr.f32.gmra.mrb[30].mxu1 %v1966_v41  ;;  %v1968_v43 = vpop.eup %1967  ;;  %1987 = vtanh.f32 %v605_v49 }
 0x1a8   : > { %1636 = vmatprep.mubr.f32.mxu1 %v1962_v37  ;;  %v1970_v44 = vpop.eup %1969  ;;  %1989 = vtanh.f32 %v600_v50 }
 0x1a9   : > { %v1972_v47 = vpop.eup %1971  ;;  %1991 = vtanh.f32 %v615_v53 }
 0x1aa   : > { %v1974_v48 = vpop.eup %1973  ;;  %1993 = vtanh.f32 %v610_v54 }
 0x1ab   : > { %1637 = vmatmul.mubr.f32.gmra.mrb[32].mxu1 %v1970_v44  ;;  %v1976_v51 = vpop.eup %1975  ;;  %1995 = vtanh.f32 %v620_v57 }
 0x1ac   : > { %1639 = vmatprep.mubr.f32.mxu1 %v1968_v43  ;;  %v1978_v52 = vpop.eup %1977 }
 0x1ad   : > { %v1980_v55 = vpop.eup %1979 }
 0x1ae   : > { %v1982_v56 = vpop.eup %1981 }
 0x1af   : > { %1640 = vmatmul.mubr.f32.gmra.mrb[34].mxu1 %v1974_v48  ;;  %v1984_v58 = vpop.eup %1983 }
 0x1b0   : > { %1642 = vmatprep.mubr.f32.mxu1 %v1972_v47  ;;  %v1986_v59 = vpop.eup %1985 }
 0x1b1   : > { %v1988_v60 = vpop.eup %1987 }
 0x1b2   : > { %v1990_v61 = vpop.eup %1989 }
 0x1b3   : > { %1643 = vmatmul.mubr.f32.gmra.mrb[36].mxu1 %v1978_v52  ;;  %v1992_v62 = vpop.eup %1991 }
 0x1b4   : > { %1645 = vmatprep.mubr.f32.mxu1 %v1976_v51  ;;  %v1994_v63 = vpop.eup %1993 }
 0x1b5   : > { %v1996_v0 = vpop.eup %1995 }
 0x1b7   : > { %1646 = vmatmul.mubr.f32.gmra.mrb[38].mxu1 %v1982_v56 }
 0x1b8   : > { %1648 = vmatprep.mubr.f32.mxu1 %v1980_v55 }
 0x1bb   : > { %1649 = vmatmul.mubr.f32.gmra.mrb[40].mxu1 %v1986_v59 }
 0x1bc   : > { %1651 = vmatprep.mubr.f32.mxu1 %v1984_v58 }
 0x1bf   : > { %1652 = vmatmul.mubr.f32.gmra.mrb[42].mxu1 %v1990_v61 }
 0x1c0   : > { %1654 = vmatprep.mubr.f32.mxu1 %v1988_v60 }
 0x1c3   : > { %1655 = vmatmul.mubr.f32.gmra.mrb[44].mxu1 %v1994_v63 }
 0x1c4   : > { %1657 = vmatprep.mubr.f32.mxu1 %v1992_v62 }
 0x1c7   : > { %1658 = vmatmul.mubr.f32.gmra.mrb[46].mxu1 %v1996_v0 }
 0x25e   : > { %v1614_v10 = vpop.f32.mrb[16].mxu1 }
 0x25f   : > { %v750_v11 = vadd.f32 %v1614_v10, %v2639_v9  ;;  %v744_v12 = vpop.f32.mrb[17].mxu1 }
 0x260   : > { %v745_v13 = vadd.f32 %v2639_v9, %v744_v12 }
 0x262   : > { %1997 = vtanh.f32 %v745_v13  ;;  %v1617_v14 = vpop.f32.mrb[18].mxu1 }
 0x263   : > { %1999 = vtanh.f32 %v750_v11  ;;  %v760_v15 = vadd.f32 %v1617_v14, %v2639_v9  ;;  %v754_v16 = vpop.f32.mrb[19].mxu1 }
 0x264   : > { %v755_v17 = vadd.f32 %v2639_v9, %v754_v16 }
 0x266   : > { %2001 = vtanh.f32 %v755_v17  ;;  %v1620_v18 = vpop.f32.mrb[20].mxu1 }
 0x267   : > { %2003 = vtanh.f32 %v760_v15  ;;  %v770_v19 = vadd.f32 %v1620_v18, %v2639_v9  ;;  %v764_v20 = vpop.f32.mrb[21].mxu1 }
 0x268   : > { %v765_v21 = vadd.f32 %v2639_v9, %v764_v20 }
 0x26a   : > { %2005 = vtanh.f32 %v765_v21  ;;  %v1623_v22 = vpop.f32.mrb[22].mxu1 }
 0x26b   : > { %2007 = vtanh.f32 %v770_v19  ;;  %v780_v23 = vadd.f32 %v1623_v22, %v2639_v9  ;;  %v774_v24 = vpop.f32.mrb[23].mxu1 }
 0x26c   : > { %v1998_v25 = vpop.eup %1997  ;;  %v775_v26 = vadd.f32 %v2639_v9, %v774_v24 }
 0x26d   : > { %v2000_v27 = vpop.eup %1999  ;;  %1692 = vmatprep.mubr.f32.mxu0 %v1998_v25 }
 0x26e   : > { %2009 = vtanh.f32 %v775_v26  ;;  %v1626_v28 = vpop.f32.mrb[24].mxu1  ;;  %1693 = vmatmul.mubr.f32.vlgmr.msra.gmra.mrb[16].mxu0 %v2000_v27 }
 0x26f   : > { %2011 = vtanh.f32 %v780_v23  ;;  %v790_v29 = vadd.f32 %v1626_v28, %v2639_v9  ;;  %v784_v30 = vpop.f32.mrb[25].mxu1 }
 0x270   : > { %v2002_v32 = vpop.eup %2001  ;;  %v785_v34 = vadd.f32 %v2639_v9, %v784_v30 }
 0x271   : > { %v2004_v35 = vpop.eup %2003  ;;  %1695 = vmatprep.mubr.f32.mxu0 %v2002_v32 }
 0x272   : > { %2013 = vtanh.f32 %v785_v34  ;;  %v1629_v36 = vpop.f32.mrb[26].mxu1  ;;  %1696 = vmatmul.mubr.f32.gmra.mrb[18].mxu0 %v2004_v35 }
 0x273   : > { %2015 = vtanh.f32 %v790_v29  ;;  %v800_v33 = vadd.f32 %v1629_v36, %v2639_v9  ;;  %v794_v37 = vpop.f32.mrb[27].mxu1 }
 0x274   : > { %v2006_v38 = vpop.eup %2005  ;;  %v795_v40 = vadd.f32 %v2639_v9, %v794_v37 }
 0x275   : > { %v2008_v41 = vpop.eup %2007  ;;  %1698 = vmatprep.mubr.f32.mxu0 %v2006_v38 }
 0x276   : > { %2017 = vtanh.f32 %v795_v40  ;;  %v1632_v39 = vpop.f32.mrb[28].mxu1  ;;  %1699 = vmatmul.mubr.f32.gmra.mrb[20].mxu0 %v2008_v41 }
 0x277   : > { %2019 = vtanh.f32 %v800_v33  ;;  %v810_v42 = vadd.f32 %v1632_v39, %v2639_v9  ;;  %v804_v43 = vpop.f32.mrb[29].mxu1 }
 0x278   : > { %v2010_v44 = vpop.eup %2009  ;;  %v805_v45 = vadd.f32 %v2639_v9, %v804_v43 }
 0x279   : > { %v2012_v46 = vpop.eup %2011  ;;  %1701 = vmatprep.mubr.f32.mxu0 %v2010_v44 }
 0x27a   : > { %2021 = vtanh.f32 %v805_v45  ;;  %v1635_v47 = vpop.f32.mrb[30].mxu1  ;;  %1702 = vmatmul.mubr.f32.gmra.mrb[22].mxu0 %v2012_v46 }
 0x27b   : > { %2023 = vtanh.f32 %v810_v42  ;;  %v820_v48 = vadd.f32 %v1635_v47, %v2639_v9  ;;  %v814_v49 = vpop.f32.mrb[31].mxu1 }
 0x27c   : > { %v2014_v50 = vpop.eup %2013  ;;  %v815_v51 = vadd.f32 %v2639_v9, %v814_v49 }
 0x27d   : > { %v2016_v52 = vpop.eup %2015  ;;  %1704 = vmatprep.mubr.f32.mxu0 %v2014_v50 }
 0x27e   : > { %2025 = vtanh.f32 %v815_v51  ;;  %v1638_v53 = vpop.f32.mrb[32].mxu1  ;;  %1705 = vmatmul.mubr.f32.gmra.mrb[24].mxu0 %v2016_v52 }
 0x27f   : > { %2027 = vtanh.f32 %v820_v48  ;;  %v830_v54 = vadd.f32 %v1638_v53, %v2639_v9  ;;  %v824_v55 = vpop.f32.mrb[33].mxu1 }
 0x280   : > { %v2018_v56 = vpop.eup %2017  ;;  %v825_v57 = vadd.f32 %v2639_v9, %v824_v55 }
 0x281   : > { %v2020_v58 = vpop.eup %2019  ;;  %1707 = vmatprep.mubr.f32.mxu0 %v2018_v56 }
 0x282   : > { %2029 = vtanh.f32 %v825_v57  ;;  %v1641_v59 = vpop.f32.mrb[34].mxu1  ;;  %1708 = vmatmul.mubr.f32.gmra.mrb[26].mxu0 %v2020_v58 }
 0x283   : > { %2031 = vtanh.f32 %v830_v54  ;;  %v840_v60 = vadd.f32 %v1641_v59, %v2639_v9  ;;  %v834_v61 = vpop.f32.mrb[35].mxu1 }
 0x284   : > { %v2022_v62 = vpop.eup %2021  ;;  %v835_v63 = vadd.f32 %v2639_v9, %v834_v61 }
 0x285   : > { %v2024_v0 = vpop.eup %2023  ;;  %1710 = vmatprep.mubr.f32.mxu0 %v2022_v62 }
 0x286   : > { %2033 = vtanh.f32 %v835_v63  ;;  %v1644_v1 = vpop.f32.mrb[36].mxu1  ;;  %1711 = vmatmul.mubr.f32.gmra.mrb[28].mxu0 %v2024_v0 }
 0x287   : > { %2035 = vtanh.f32 %v840_v60  ;;  %v850_v2 = vadd.f32 %v1644_v1, %v2639_v9  ;;  %v844_v3 = vpop.f32.mrb[37].mxu1 }
 0x288   : > { %v2026_v31 = vpop.eup %2025  ;;  %v845_v4 = vadd.f32 %v2639_v9, %v844_v3 }
 0x289   : > { %v2028_v5 = vpop.eup %2027  ;;  %1713 = vmatprep.mubr.f32.mxu0 %v2026_v31 }
 0x28a   : > { %2037 = vtanh.f32 %v845_v4  ;;  %v1647_v6 = vpop.f32.mrb[38].mxu1  ;;  %1714 = vmatmul.mubr.f32.gmra.mrb[30].mxu0 %v2028_v5 }
 0x28b   : > { %2039 = vtanh.f32 %v850_v2  ;;  %v860_v7 = vadd.f32 %v1647_v6, %v2639_v9  ;;  %v854_v8 = vpop.f32.mrb[39].mxu1 }
 0x28c   : > { %v2030_v10 = vpop.eup %2029  ;;  %v855_v11 = vadd.f32 %v2639_v9, %v854_v8 }
 0x28d   : > { %v2032_v12 = vpop.eup %2031  ;;  %1716 = vmatprep.mubr.f32.mxu0 %v2030_v10 }
 0x28e   : > { %2041 = vtanh.f32 %v855_v11  ;;  %v1650_v13 = vpop.f32.mrb[40].mxu1  ;;  %1717 = vmatmul.mubr.f32.gmra.mrb[32].mxu0 %v2032_v12 }
 0x28f   : > { %2043 = vtanh.f32 %v860_v7  ;;  %v870_v14 = vadd.f32 %v1650_v13, %v2639_v9  ;;  %v864_v15 = vpop.f32.mrb[41].mxu1 }
 0x290   : > { %v2034_v16 = vpop.eup %2033  ;;  %v865_v17 = vadd.f32 %v2639_v9, %v864_v15 }
 0x291   : > { %v2036_v18 = vpop.eup %2035  ;;  %1719 = vmatprep.mubr.f32.mxu0 %v2034_v16 }
 0x292   : > { %2045 = vtanh.f32 %v865_v17  ;;  %v1653_v19 = vpop.f32.mrb[42].mxu1  ;;  %1720 = vmatmul.mubr.f32.gmra.mrb[34].mxu0 %v2036_v18 }
 0x293   : > { %2047 = vtanh.f32 %v870_v14  ;;  %v880_v20 = vadd.f32 %v1653_v19, %v2639_v9  ;;  %v874_v21 = vpop.f32.mrb[43].mxu1 }
 0x294   : > { %v2038_v22 = vpop.eup %2037  ;;  %v875_v23 = vadd.f32 %v2639_v9, %v874_v21 }
 0x295   : > { %v2040_v24 = vpop.eup %2039  ;;  %1722 = vmatprep.mubr.f32.mxu0 %v2038_v22 }
 0x296   : > { %2049 = vtanh.f32 %v875_v23  ;;  %v1656_v25 = vpop.f32.mrb[44].mxu1  ;;  %1723 = vmatmul.mubr.f32.gmra.mrb[36].mxu0 %v2040_v24 }
 0x297   : > { %2051 = vtanh.f32 %v880_v20  ;;  %v890_v26 = vadd.f32 %v1656_v25, %v2639_v9  ;;  %v884_v27 = vpop.f32.mrb[45].mxu1 }
 0x298   : > { %v2042_v28 = vpop.eup %2041  ;;  %v885_v29 = vadd.f32 %v2639_v9, %v884_v27 }
 0x299   : > { %v2044_v30 = vpop.eup %2043  ;;  %1725 = vmatprep.mubr.f32.mxu0 %v2042_v28 }
 0x29a   : > { %2053 = vtanh.f32 %v885_v29  ;;  %v1659_v32 = vpop.f32.mrb[46].mxu1  ;;  %1726 = vmatmul.mubr.f32.gmra.mrb[38].mxu0 %v2044_v30 }
 0x29b   : > { %2055 = vtanh.f32 %v890_v26  ;;  %v900_v34 = vadd.f32 %v1659_v32, %v2639_v9  ;;  %v894_v35 = vpop.f32.mrb[47].mxu1 }
 0x29c   : > { %v2046_v36 = vpop.eup %2045  ;;  %v895_v33 = vadd.f32 %v2639_v9, %v894_v35  ;;  %v2676_v9 = vld [vmem:[%s2803_s6] ss:$0 sm:$0xff] }
 0x29d   : > { %v2048_v37 = vpop.eup %2047  ;;  %1728 = vmatprep.mubr.f32.mxu0 %v2046_v36 }
 0x29e   : > { %2057 = vtanh.f32 %v895_v33  ;;  %1729 = vmatmul.mubr.f32.gmra.mrb[40].mxu0 %v2048_v37 }
 0x29f   : > { %2059 = vtanh.f32 %v900_v34 }
 0x2a0   : > { %v2050_v38 = vpop.eup %2049 }
 0x2a1   : > { %v2052_v40 = vpop.eup %2051  ;;  %1731 = vmatprep.mubr.f32.mxu0 %v2050_v38 }
 0x2a2   : > { %1732 = vmatmul.mubr.f32.gmra.mrb[42].mxu0 %v2052_v40 }
 0x2a4   : > { %v2054_v41 = vpop.eup %2053 }
 0x2a5   : > { %v2056_v39 = vpop.eup %2055  ;;  %1734 = vmatprep.mubr.f32.mxu0 %v2054_v41 }
 0x2a6   : > { %1735 = vmatmul.mubr.f32.gmra.mrb[44].mxu0 %v2056_v39 }
 0x2a8   : > { %v2058_v42 = vpop.eup %2057 }
 0x2a9   : > { %v2060_v43 = vpop.eup %2059  ;;  %1737 = vmatprep.mubr.f32.mxu0 %v2058_v42 }
 0x2aa   : > { %1738 = vmatmul.mubr.f32.gmra.mrb[46].mxu0 %v2060_v43 }
 0x341   : > { %v1694_v44 = vpop.f32.mrb[16].mxu0 }
 0x342   : > { %v1030_v45 = vadd.f32 %v1694_v44, %v2676_v9  ;;  %v1024_v46 = vpop.f32.mrb[17].mxu0 }
 0x343   : > { %v1025_v47 = vadd.f32 %v2676_v9, %v1024_v46 }
 0x344   : > { %1184 = vst [vmem:[%s2682_s12 + $0x8] sm:$0xff] %v1030_v45 }
 0x345   : > { %1183 = vst [vmem:[%s2682_s12] sm:$0xff] %v1025_v47  ;;  %v1697_v48 = vpop.f32.mrb[18].mxu0 }
 0x346   : > { %v1040_v49 = vadd.f32 %v1697_v48, %v2676_v9  ;;  %v1034_v50 = vpop.f32.mrb[19].mxu0 }
 0x347   : > { %v1035_v51 = vadd.f32 %v2676_v9, %v1034_v50 }
 0x348   : > { %1186 = vst [vmem:[%s2682_s12 + $0x18] sm:$0xff] %v1040_v49 }
 0x349   : > { %1185 = vst [vmem:[%s2682_s12 + $0x10] sm:$0xff] %v1035_v51  ;;  %v1700_v52 = vpop.f32.mrb[20].mxu0 }
 0x34a   : > { %v1050_v53 = vadd.f32 %v1700_v52, %v2676_v9  ;;  %v1044_v54 = vpop.f32.mrb[21].mxu0 }
 0x34b   : > { %v1045_v55 = vadd.f32 %v2676_v9, %v1044_v54 }
 0x34c   : > { %1188 = vst [vmem:[%s2682_s12 + $0x28] sm:$0xff] %v1050_v53 }
 0x34d   : > { %1187 = vst [vmem:[%s2682_s12 + $0x20] sm:$0xff] %v1045_v55  ;;  %v1703_v56 = vpop.f32.mrb[22].mxu0 }
 0x34e   : > { %v1060_v57 = vadd.f32 %v1703_v56, %v2676_v9  ;;  %v1054_v58 = vpop.f32.mrb[23].mxu0 }
 0x34f   : > { %v1055_v59 = vadd.f32 %v2676_v9, %v1054_v58 }
 0x350   : > { %1190 = vst [vmem:[%s2682_s12 + $0x38] sm:$0xff] %v1060_v57 }
 0x351   : > { %1189 = vst [vmem:[%s2682_s12 + $0x30] sm:$0xff] %v1055_v59  ;;  %v1706_v60 = vpop.f32.mrb[24].mxu0 }
 0x352   : > { %v1070_v61 = vadd.f32 %v1706_v60, %v2676_v9  ;;  %v1064_v62 = vpop.f32.mrb[25].mxu0 }
 0x353   : > { %v1065_v63 = vadd.f32 %v2676_v9, %v1064_v62 }
 0x354   : > { %1192 = vst [vmem:[%s2682_s12 + $0x48] sm:$0xff] %v1070_v61 }
 0x355   : > { %1191 = vst [vmem:[%s2682_s12 + $0x40] sm:$0xff] %v1065_v63  ;;  %v1709_v0 = vpop.f32.mrb[26].mxu0 }
 0x356   : > { %v1080_v1 = vadd.f32 %v1709_v0, %v2676_v9  ;;  %v1074_v2 = vpop.f32.mrb[27].mxu0 }
 0x357   : > { %v1075_v3 = vadd.f32 %v2676_v9, %v1074_v2 }
 0x358   : > { %1194 = vst [vmem:[%s2682_s12 + $0x58] sm:$0xff] %v1080_v1 }
 0x359   : > { %1193 = vst [vmem:[%s2682_s12 + $0x50] sm:$0xff] %v1075_v3  ;;  %v1712_v31 = vpop.f32.mrb[28].mxu0 }
 0x35a   : > { %v1090_v4 = vadd.f32 %v1712_v31, %v2676_v9  ;;  %v1084_v5 = vpop.f32.mrb[29].mxu0 }
 0x35b   : > { %v1085_v6 = vadd.f32 %v2676_v9, %v1084_v5 }
 0x35c   : > { %1196 = vst [vmem:[%s2682_s12 + $0x68] sm:$0xff] %v1090_v4 }
 0x35d   : > { %1195 = vst [vmem:[%s2682_s12 + $0x60] sm:$0xff] %v1085_v6  ;;  %v1715_v7 = vpop.f32.mrb[30].mxu0 }
 0x35e   : > { %v1100_v8 = vadd.f32 %v1715_v7, %v2676_v9  ;;  %v1094_v10 = vpop.f32.mrb[31].mxu0 }
 0x35f   : > { %v1095_v11 = vadd.f32 %v2676_v9, %v1094_v10 }
 0x360   : > { %1198 = vst [vmem:[%s2682_s12 + $0x78] sm:$0xff] %v1100_v8 }
 0x361   : > { %1197 = vst [vmem:[%s2682_s12 + $0x70] sm:$0xff] %v1095_v11  ;;  %v1718_v12 = vpop.f32.mrb[32].mxu0 }
 0x362   : > { %v1110_v13 = vadd.f32 %v1718_v12, %v2676_v9  ;;  %v1104_v14 = vpop.f32.mrb[33].mxu0 }
 0x363   : > { %v1105_v15 = vadd.f32 %v2676_v9, %v1104_v14 }
 0x364   : > { %1200 = vst [vmem:[%s2682_s12 + $0x88] sm:$0xff] %v1110_v13 }
 0x365   : > { %1199 = vst [vmem:[%s2682_s12 + $0x80] sm:$0xff] %v1105_v15  ;;  %v1721_v16 = vpop.f32.mrb[34].mxu0 }
 0x366   : > { %v1120_v17 = vadd.f32 %v1721_v16, %v2676_v9  ;;  %v1114_v18 = vpop.f32.mrb[35].mxu0 }
 0x367   : > { %v1115_v19 = vadd.f32 %v2676_v9, %v1114_v18 }
 0x368   : > { %1202 = vst [vmem:[%s2682_s12 + $0x98] sm:$0xff] %v1120_v17 }
 0x369   : > { %1201 = vst [vmem:[%s2682_s12 + $0x90] sm:$0xff] %v1115_v19  ;;  %v1724_v20 = vpop.f32.mrb[36].mxu0 }
 0x36a   : > { %v1130_v21 = vadd.f32 %v1724_v20, %v2676_v9  ;;  %v1124_v22 = vpop.f32.mrb[37].mxu0 }
 0x36b   : > { %v1125_v23 = vadd.f32 %v2676_v9, %v1124_v22 }
 0x36c   : > { %1204 = vst [vmem:[%s2682_s12 + $0xa8] sm:$0xff] %v1130_v21 }
 0x36d   : > { %1203 = vst [vmem:[%s2682_s12 + $0xa0] sm:$0xff] %v1125_v23  ;;  %v1727_v24 = vpop.f32.mrb[38].mxu0 }
 0x36e   : > { %v1140_v25 = vadd.f32 %v1727_v24, %v2676_v9  ;;  %v1134_v26 = vpop.f32.mrb[39].mxu0 }
 0x36f   : > { %v1135_v27 = vadd.f32 %v2676_v9, %v1134_v26 }
 0x370   : > { %1206 = vst [vmem:[%s2682_s12 + $0xb8] sm:$0xff] %v1140_v25 }
 0x371   : > { %1205 = vst [vmem:[%s2682_s12 + $0xb0] sm:$0xff] %v1135_v27  ;;  %v1730_v28 = vpop.f32.mrb[40].mxu0 }
 0x372   : > { %v1150_v29 = vadd.f32 %v1730_v28, %v2676_v9  ;;  %v1144_v30 = vpop.f32.mrb[41].mxu0 }
 0x373   : > { %v1145_v32 = vadd.f32 %v2676_v9, %v1144_v30 }
 0x374   : > { %1208 = vst [vmem:[%s2682_s12 + $0xc8] sm:$0xff] %v1150_v29 }
 0x375   : > { %1207 = vst [vmem:[%s2682_s12 + $0xc0] sm:$0xff] %v1145_v32  ;;  %v1733_v34 = vpop.f32.mrb[42].mxu0 }
 0x376   : > { %v1160_v35 = vadd.f32 %v1733_v34, %v2676_v9  ;;  %v1154_v36 = vpop.f32.mrb[43].mxu0 }
 0x377   : > { %v1155_v33 = vadd.f32 %v2676_v9, %v1154_v36 }
 0x378   : > { %1210 = vst [vmem:[%s2682_s12 + $0xd8] sm:$0xff] %v1160_v35 }
 0x379   : > { %1209 = vst [vmem:[%s2682_s12 + $0xd0] sm:$0xff] %v1155_v33  ;;  %v1736_v37 = vpop.f32.mrb[44].mxu0 }
 0x37a   : > { %v1170_v38 = vadd.f32 %v1736_v37, %v2676_v9  ;;  %v1164_v40 = vpop.f32.mrb[45].mxu0 }
 0x37b   : > { %v1165_v41 = vadd.f32 %v2676_v9, %v1164_v40 }
 0x37c   : > { %1212 = vst [vmem:[%s2682_s12 + $0xe8] sm:$0xff] %v1170_v38 }
 0x37d   : > { %1211 = vst [vmem:[%s2682_s12 + $0xe0] sm:$0xff] %v1165_v41  ;;  %v1739_v39 = vpop.f32.mrb[46].mxu0 }
 0x37e   : > { %v1180_v42 = vadd.f32 %v1739_v39, %v2676_v9  ;;  %v1174_v43 = vpop.f32.mrb[47].mxu0 }
 0x37f   : > { %v1175_v44 = vadd.f32 %v2676_v9, %v1174_v43 }
 0x380   : > { %1214 = vst [vmem:[%s2682_s12 + $0xf8] sm:$0xff] %v1180_v42 }
 0x381   : > { %1213 = vst [vmem:[%s2682_s12 + $0xf0] sm:$0xff] %v1175_v44 }
 0x382   : > { %2188 = shalt.err (!%p2185_p4)
}
 0x383   : > { %s2189_s13 = scalar_lea.hbm %s2748_s23, 4096  ;;  %s2193_s14 = scalar_lea.hbm %s2804_s7, 8192 }
 0x384   : > { %p2190_p9 = scmp.ne.s32.totalorder %s2748_s23, %s2189_s13  ;;  %p2194_p8 = scmp.lt.u32.totalorder %s2748_s23, %s2804_s7 }
 0x385   : > { %p2195_p13 = scmp.lt.u32.totalorder %s2193_s14, %s2189_s13  ;;  %p2197_p10 = scmp.lt.u32.totalorder %s2189_s13, %s2748_s23 }
 0x386   : > { %p2191_p0 = pnand %p2190_p9, %p2454_p5 }
 0x387   : > { %p2196_p6 = por %p2195_p13, %p2194_p8 }
 0x388   : > { %p2192_p11 = pneg %p2191_p0 }
 0x389   : > { %p2198_p3 = por %p2197_p10, %p2196_p6 }
 0x38b   : > { %p2199_p7 = pnand %p2198_p3, %p2192_p11 }
 0x38d   : > { %2202 = shalt.err (!%p2199_p7)
}
 0x38e   : > { %s2258_s16 = smov 128   ;;  %s2259_s29 = smov 8  }
 0x38f   : > { %1866 = dma.vmem_to_hbm [thread:$0]  (%p2454_p5), %s2750_s21, 4096, %s2748_s23, %s1216_s28, %s2258_s16, %s2258_s16, %s2259_s29  }
 0x390 PF: > { %s2824_s11 = sld [smem:[#allocation15_spill]]  ;;  %s1244_s8 = sand.u32 1, %s2237_s24  }
 0x391   : > { %p2826_p1 = scmp.ge.s32.totalorder %s2249_s27, 2  ;;  %s1245_s30 = scalar_lea.sflag [#allocation4], %s1244_s8 }
 0x396   : > { %p2825_p12 = scmp.ne.s32.totalorder %s2824_s11, 0 }
 0x398   : > { %p1883_p2 = pnand %p2826_p1, %p2825_p12 }
 0x39a   : > { %2232 = dma.done.wait (!%p1883_p2), %s1245_s30, 4096  }
 0x39b   : > { %2234 = vsyncadd (!%p1883_p2), %s1245_s30, 4294963200  ;;  %p22_p4 = scmp.ge.s32.totalorder %s2440_s22, 4   ;;  %s2827_s24 = smov %s2241_s25 }
 0x39c   : > { %s2828_s25 = smov %s2245_s26  ;;  %s2829_s26 = smov %s2450_s18 }
 0x39d   : > { %s2830_s27 = smov %s2440_s22  ;;  %24 = sbr.rel (!%p22_p4) target bundleno = 7 (0x7), region = 105 }
 0x3a4   :  { %1250 = vsyncpa [#allocation3], 1 }
 0x3a5   :  { %1252 = vsyncpa [#allocation3 + $0x1], 1 }
 0x3a6   :  { %1253 = vsyncpa [#allocation6], 1 }
 0x3a7   :  { %1254 = vsyncpa [#allocation9], 1 }
 0x3a8   :  { %1255 = vsyncpa [#allocation4], 1 }
 0x3a9   :  { %1257 = vsyncpa [#allocation4 + $0x1], 1 }

</bundles_post_ra>
